<compile_context>
chip_gen: v7x
topology: tpu7x:2x2x1
jax: 0.10.0
libtpu: 0.0.40
codegen_flags: <defaults>
</compile_context>

<pallas_src>
import functools

import jax
import jax.numpy as jnp
from jax.experimental import pallas as pl
from jax.experimental.pallas import tpu as pltpu


# ----------------------------------------------------------------------------
# helpers: generation-aware VMEM sizing, tile selection
# ----------------------------------------------------------------------------
def _round_up(v, m):
    return ((v + m - 1) // m) * m


@functools.lru_cache(maxsize=1)
def _vmem_capacity_bytes():
    """Physical VMEM per TensorCore (v5e/v6e: 128 MiB, v7x: 64 MiB)."""
    try:
        info = pltpu.get_tpu_info()
        for attr in ("vmem_capacity_bytes", "vmem_size_bytes", "vmem_bytes"):
            v = getattr(info, attr, None)
            if v:
                return int(v)
    except Exception:
        pass
    return 64 * 1024 * 1024  # conservative fallback (v7x)


def _vmem_limit_bytes():
    """Scoped-VMEM limit handed to Mosaic (well above the 16/32 MiB defaults)."""
    return int(0.85 * _vmem_capacity_bytes())


def _default_budget_bytes():
    """Budget for tile sizing / fused-vs-tiled decision.

    Deliberately ~0.5x physical VMEM: leaves headroom for compiler temporaries
    and the default double-buffering the estimates below only roughly model.
    Smaller physical VMEM on v7x automatically pushes medium graphs onto the
    tiled path, whose "parallel" dst-row axis can be split across both cores.
    """
    return int(0.5 * _vmem_capacity_bytes())


def _tile_candidates(n, cands):
    out = sorted({c for c in tuple(cands) + (n,) if 0 < c <= n and n % c == 0},
                 reverse=True)
    return out or [n]


def _choose_tile(n, cands, footprint_fn, budget):
    cand = _tile_candidates(n, cands)
    for c in cand:
        if footprint_fn(c) <= budget:
            return c
    return cand[-1]


# ----------------------------------------------------------------------------
# Fused multi-layer kernel (small graphs: everything resident in VMEM)
# ----------------------------------------------------------------------------
def _fused_sage_kernel(*refs, num_layers, co_pads, reassoc, relu_flags):
    a_ref, x_ref = refs[0], refs[1]
    o_ref = refs[-1]

    a = a_ref[...]            # (N_pad, N_pad) bf16
    h = x_ref[...]            # (N_pad, C_pad) bf16
    for l in range(num_layers):
        wcat_ref = refs[2 + 2 * l]   # (ci_pad, 2*co_pad)  = [W_l^T | W_r^T] bf16
        b_ref = refs[3 + 2 * l]      # (1, co_pad) f32
        co = co_pads[l]
        wcat = wcat_ref[...]
        if reassoc[l]:
            # A @ (X @ W_l): contract the N*N product over the (smaller) C_out.
            # One wide dot produces both X@W_l and X@W_r (self term).
            hw = jnp.dot(h, wcat, preferred_element_type=jnp.float32)
            agg_term = jnp.dot(a, hw[:, :co].astype(jnp.bfloat16),
                               preferred_element_type=jnp.float32)
            out = agg_term + hw[:, co:] + b_ref[...]
        else:
            # (A @ X) @ W_l: contract the N*N product over the (smaller) C_in.
            agg = jnp.dot(a, h, preferred_element_type=jnp.float32)
            agg_term = jnp.dot(agg.astype(jnp.bfloat16), wcat[:, :co],
                               preferred_element_type=jnp.float32)
            self_term = jnp.dot(h, wcat[:, co:],
                                preferred_element_type=jnp.float32)
            out = agg_term + self_term + b_ref[...]
        if relu_flags[l]:
            out = jnp.maximum(out, 0.0)
        if l + 1 < num_layers:
            h = out.astype(jnp.bfloat16)
        else:
            o_ref[...] = out.astype(o_ref.dtype)


def _fused_vmem_bytes(n_pad, cin_pad, prepared_params):
    """Rough VMEM footprint of the fused path (default double buffering)."""
    a_b = n_pad * n_pad * 2
    x_b = n_pad * cin_pad * 2
    w_b = sum(lp["w_cat"].shape[0] * lp["w_cat"].shape[1] * 2
              + lp["cout_pad"] * 4 for lp in prepared_params)
    out_b = n_pad * prepared_params[-1]["cout_pad"] * 4
    # allowance for the per-layer f32 intermediates produced inside the kernel
    tmp_b = sum(n_pad * lp["cout_pad"] * 4 * 3 for lp in prepared_params)
    return 2 * (a_b + x_b + w_b + out_b) + tmp_b


def _fused_forward(a_bf16, x_bf16, prepared_params, reassoc, relu_flags):
    n_pad = a_bf16.shape[0]
    cin_pad = x_bf16.shape[1]
    cout_last_pad = prepared_params[-1]["cout_pad"]

    kernel = functools.partial(
        _fused_sage_kernel,
        num_layers=len(prepared_params),
        co_pads=tuple(lp["cout_pad"] for lp in prepared_params),
        reassoc=tuple(reassoc),
        relu_flags=tuple(relu_flags),
    )

    in_specs = [
        pl.BlockSpec((n_pad, n_pad), lambda i: (0, 0)),    # A_norm (bf16)
        pl.BlockSpec((n_pad, cin_pad), lambda i: (0, 0)),  # X      (bf16)
    ]
    args = [a_bf16, x_bf16]
    flops = 0
    bytes_accessed = a_bf16.size * 2 + x_bf16.size * 2
    for lp in prepared_params:
        ci, co2 = lp["w_cat"].shape
        co = lp["cout_pad"]
        in_specs += [
            pl.BlockSpec((ci, co2), lambda i: (0, 0)),     # [W_l^T|W_r^T] bf16
            pl.BlockSpec((1, co), lambda i: (0, 0)),       # bias f32
        ]
        args += [lp["w_cat"], lp["b"]]
        flops += 2 * n_pad * n_pad * co + 2 * n_pad * ci * co2
        bytes_accessed += ci * co2 * 2 + co * 4
    bytes_accessed += n_pad * cout_last_pad * 4

    return pl.pallas_call(
        kernel,
        out_shape=jax.ShapeDtypeStruct((n_pad, cout_last_pad), jnp.float32),
        grid=(1,),
        in_specs=in_specs,
        out_specs=pl.BlockSpec((n_pad, cout_last_pad), lambda i: (0, 0)),
        compiler_params=pltpu.CompilerParams(
            dimension_semantics=("arbitrary",),
            vmem_limit_bytes=_vmem_limit_bytes()),
        cost_estimate=pl.CostEstimate(flops=flops, transcendentals=0,
                                      bytes_accessed=bytes_accessed),
    )(*args)


# ----------------------------------------------------------------------------
# Tiled per-layer path (larger graphs)
# ----------------------------------------------------------------------------
def _proj_kernel(x_ref, wcat_ref, b_ref, z_ref, s_ref, *, cout_pad):
    # Single wide dot: [Z | S'] = X @ [W_l^T | W_r^T]; Z feeds aggregation
    # (bf16), S = S' + b stays f32.
    x = x_ref[...].astype(jnp.bfloat16)
    hw = jnp.dot(x, wcat_ref[...], preferred_element_type=jnp.float32)
    z_ref[...] = hw[:, :cout_pad].astype(z_ref.dtype)
    s_ref[...] = (hw[:, cout_pad:] + b_ref[...]).astype(s_ref.dtype)


def _project(h, w_cat, b, cout_pad, budget):
    n_pad, cin_pad = h.shape
    cout2 = w_cat.shape[1]
    in_bytes = jnp.dtype(h.dtype).itemsize

    def footprint(tm):
        return (2 * tm * cin_pad * in_bytes       # X tiles (double-buffered)
                + 2 * cin_pad * cout2 * 2         # resident weights
                + 2 * cout_pad * 4                # bias
                + 2 * tm * cout_pad * 2           # Z out tiles
                + 2 * tm * cout_pad * 4)          # S out tiles

    tm = _choose_tile(n_pad, (1024, 512, 256, 128), footprint, budget)
    flops = 2 * n_pad * cin_pad * cout2
    bytes_accessed = (n_pad * cin_pad * in_bytes + cin_pad * cout2 * 2
                      + n_pad * cout_pad * (2 + 4))

    kernel = functools.partial(_proj_kernel, cout_pad=cout_pad)
    return pl.pallas_call(
        kernel,
        out_shape=(jax.ShapeDtypeStruct((n_pad, cout_pad), jnp.bfloat16),
                   jax.ShapeDtypeStruct((n_pad, cout_pad), jnp.float32)),
        grid=(n_pad // tm,),
        in_specs=[
            pl.BlockSpec((tm, cin_pad), lambda i: (i, 0)),
            pl.BlockSpec((cin_pad, cout2), lambda i: (0, 0)),   # resident
            pl.BlockSpec((1, cout_pad), lambda i: (0, 0)),
        ],
        out_specs=(pl.BlockSpec((tm, cout_pad), lambda i: (i, 0)),
                   pl.BlockSpec((tm, cout_pad), lambda i: (i, 0))),
        compiler_params=pltpu.CompilerParams(
            dimension_semantics=("parallel",),
            vmem_limit_bytes=_vmem_limit_bytes()),
        cost_estimate=pl.CostEstimate(flops=flops, transcendentals=0,
                                      bytes_accessed=bytes_accessed),
    )(h, w_cat, b)


def _agg_kernel_scratch(a_ref, z_ref, s_ref, o_ref, acc_ref, *,
                        apply_relu, tk, z_resident):
    # f32 scratch accumulator; used when the layer output is bf16.
    k = pl.program_id(1)

    @pl.when(k == 0)
    def _():
        acc_ref[...] = jnp.zeros_like(acc_ref)

    if z_resident:
        start = pl.multiple_of(k * tk, tk)
        z = z_ref[pl.ds(start, tk), :]
    else:
        z = z_ref[...]
    acc_ref[...] += jnp.dot(a_ref[...], z, preferred_element_type=jnp.float32)

    @pl.when(k == pl.num_programs(1) - 1)
    def _():
        out = acc_ref[...] + s_ref[...]
        if apply_relu:
            out = jnp.maximum(out, 0.0)
        o_ref[...] = out.astype(o_ref.dtype)


def _agg_kernel_inplace(a_ref, z_ref, s_ref, o_ref, *,
                        apply_relu, tk, z_resident):
    # f32 output: accumulate directly into the (VMEM-resident) output block.
    k = pl.program_id(1)

    @pl.when(k == 0)
    def _():
        o_ref[...] = s_ref[...]

    if z_resident:
        start = pl.multiple_of(k * tk, tk)
        z = z_ref[pl.ds(start, tk), :]
    else:
        z = z_ref[...]
    o_ref[...] += jnp.dot(a_ref[...], z, preferred_element_type=jnp.float32)

    if apply_relu:
        @pl.when(k == pl.num_programs(1) - 1)
        def _():
            o_ref[...] = jnp.maximum(o_ref[...], 0.0)


def _aggregate(a_bf16, z, s, *, apply_relu, out_dtype, budget):
    n_pad = a_bf16.shape[0]
    cout_pad = z.shape[1]
    out_bytes = jnp.dtype(out_dtype).itemsize
    use_scratch = jnp.dtype(out_dtype) != jnp.dtype(jnp.float32)
    z_res_bytes = 2 * n_pad * cout_pad * 2

    def fixed(tm):
        b = 2 * tm * cout_pad * 4 + 2 * tm * cout_pad * out_bytes
        if use_scratch:
            b += tm * cout_pad * 4
        return b

    # Keep the whole Z resident whenever it fits next to the smallest tiles.
    z_resident = (z_res_bytes + 2 * 128 * 128 * 2 + fixed(128)) <= budget

    def footprint(tm, tk):
        a_b = 2 * tm * tk * 2
        z_b = z_res_bytes if z_resident else 2 * tk * cout_pad * 2
        return a_b + z_b + fixed(tm)

    tm_cands = _tile_candidates(n_pad, (1024, 512, 256, 128))
    tk_cands = _tile_candidates(n_pad, (4096, 2048, 1024, 512, 256, 128))
    best = None
    for tm_c in tm_cands:
        for tk_c in tk_cands:
            if footprint(tm_c, tk_c) <= budget:
                steps = (n_pad // tm_c) * (n_pad // tk_c)
                key = (steps, -tk_c, -tm_c)
                if best is None or key < best[0]:
                    best = (key, tm_c, tk_c)
    if best is None:
        tm, tk = tm_cands[-1], tk_cands[-1]
        z_resident = False
    else:
        tm, tk = best[1], best[2]

    if z_resident:
        z_spec = pl.BlockSpec((n_pad, cout_pad), lambda i, k: (0, 0))
    else:
        z_spec = pl.BlockSpec((tk, cout_pad), lambda i, k: (k, 0))

    if use_scratch:
        kernel = functools.partial(_agg_kernel_scratch, apply_relu=apply_relu,
                                   tk=tk, z_resident=z_resident)
        scratch_shapes = [pltpu.VMEM((tm, cout_pad), jnp.float32)]
    else:
        kernel = functools.partial(_agg_kernel_inplace, apply_relu=apply_relu,
                                   tk=tk, z_resident=z_resident)
        scratch_shapes = []

    flops = 2 * n_pad * n_pad * cout_pad
    bytes_accessed = (n_pad * n_pad * 2 + n_pad * cout_pad * 2
                      + n_pad * cout_pad * 4 + n_pad * cout_pad * out_bytes)

    return pl.pallas_call(
        kernel,
        out_shape=jax.ShapeDtypeStruct((n_pad, cout_pad), out_dtype),
        grid=(n_pad // tm, n_pad // tk),
        in_specs=[
            pl.BlockSpec((tm, tk), lambda i, k: (i, k)),        # A tile
            z_spec,                                             # Z (resident)
            pl.BlockSpec((tm, cout_pad), lambda i, k: (i, 0)),  # S tile
        ],
        out_specs=pl.BlockSpec((tm, cout_pad), lambda i, k: (i, 0)),
        scratch_shapes=scratch_shapes,
        compiler_params=pltpu.CompilerParams(
            dimension_semantics=("parallel", "arbitrary"),
            vmem_limit_bytes=_vmem_limit_bytes()),
        cost_estimate=pl.CostEstimate(flops=flops, transcendentals=0,
                                      bytes_accessed=bytes_accessed),
    )(a_bf16, z, s)


# ----------------------------------------------------------------------------
# Parameters
# ----------------------------------------------------------------------------
def init_graphsage_params(key, in_channels, hidden_channels, out_channels,
                          num_layers=2):
    """Glorot-ish init matching SAGEConv parameter shapes (lin_l bias, lin_r none)."""
    dims = []
    current = in_channels
    for _ in range(num_layers - 1):
        dims.append((current, hidden_channels))
        current = hidden_channels
    dims.append((current, out_channels))

    params = []
    for c_in, c_out in dims:
        key, k1, k2 = jax.random.split(key, 3)
        scale = (2.0 / (c_in + c_out)) ** 0.5
        w_l = jax.random.normal(k1, (c_out, c_in), jnp.float32) * scale
        w_r = jax.random.normal(k2, (c_out, c_in), jnp.float32) * scale
        b_l = jnp.zeros((c_out,), jnp.float32)
        params.append({"w_l": w_l, "w_r": w_r, "b_l": b_l})
    return params


def prepare_params(params):
    """Pre-transpose, zero-pad channels to 128 multiples, concat [W_l^T|W_r^T],
    cast to bf16. Done once, outside the forward hot path."""
    prepared = []
    for layer in params:
        c_out, c_in = layer["w_l"].shape
        cin_pad = _round_up(c_in, 128)
        cout_pad = _round_up(c_out, 128)
        w_cat = jnp.zeros((cin_pad, 2 * cout_pad), jnp.float32)
        w_cat = w_cat.at[:c_in, :c_out].set(layer["w_l"].T)
        w_cat = w_cat.at[:c_in, cout_pad:cout_pad + c_out].set(layer["w_r"].T)
        b = jnp.zeros((1, cout_pad), jnp.float32)
        b = b.at[0, :c_out].set(layer["b_l"])
        prepared.append({
            "w_cat": w_cat.astype(jnp.bfloat16),
            "b": b,
            "c_in": c_in, "c_out": c_out,
            "cin_pad": cin_pad, "cout_pad": cout_pad,
        })
    return prepared


# ----------------------------------------------------------------------------
# Forward
# ----------------------------------------------------------------------------
def build_normalized_adjacency(edge_index, num_nodes):
    """Dense A_norm with A_norm[dst, src] = multiplicity / in_degree(dst).

    Nodes with no incoming edges get an all-zero row (scatter-mean of empty = 0,
    matching PyG)."""
    src, dst = edge_index[0], edge_index[1]
    a = jnp.zeros((num_nodes, num_nodes), jnp.float32)
    a = a.at[dst, src].add(1.0)
    deg = a.sum(axis=1, keepdims=True)
    return a / jnp.maximum(deg, 1.0)


def graphsage_forward(prepared_params, x, edge_index, *, force_tiled=False,
                      vmem_budget_bytes=None):
    n, c_in = x.shape
    cin_pad = prepared_params[0]["cin_pad"]
    n_pad = _round_up(n, 128)
    budget = vmem_budget_bytes or _default_budget_bytes()

    # Dense normalized adjacency (built in f32 for exact means, cast to bf16).
    a = build_normalized_adjacency(edge_index, n)
    a_bf16 = jnp.pad(a, ((0, n_pad - n), (0, n_pad - n))).astype(jnp.bfloat16)
    x_pad = jnp.pad(x.astype(jnp.float32), ((0, n_pad - n), (0, cin_pad - c_in)))

    num_layers = len(prepared_params)
    relu_flags = [i < num_layers - 1 for i in range(num_layers)]

    use_fused = (not force_tiled) and (
        _fused_vmem_bytes(n_pad, cin_pad, prepared_params) <= budget)

    if use_fused:
        # Reassociate per layer based on the padded contraction dims.
        reassoc = [lp["cout_pad"] <= lp["cin_pad"] for lp in prepared_params]
        out_pad = _fused_forward(a_bf16, x_pad.astype(jnp.bfloat16),
                                 prepared_params, reassoc, relu_flags)
    else:
        h = x_pad.astype(jnp.bfloat16)   # bf16 activations between layers
        for li, (lp, relu) in enumerate(zip(prepared_params, relu_flags)):
            last = li == num_layers - 1
            z, s = _project(h, lp["w_cat"], lp["b"], lp["cout_pad"], budget)
            h = _aggregate(a_bf16, z, s, apply_relu=relu,
                           out_dtype=jnp.float32 if last else jnp.bfloat16,
                           budget=budget)
        out_pad = h

    c_out = prepared_params[-1]["c_out"]
    # F.dropout with training=False is identity (inference semantics).
    return out_pad[:n, :c_out].astype(jnp.float32)  # also the "embedding_output"


# Pure-JAX f32 reference (for a tolerance check only).
def graphsage_reference(params, x, edge_index):
    n = x.shape[0]
    a = build_normalized_adjacency(edge_index, n)
    h = x
    for i, layer in enumerate(params):
        agg = a @ h
        h = agg @ layer["w_l"].T + h @ layer["w_r"].T + layer["b_l"]
        if i < len(params) - 1:
            h = jnp.maximum(h, 0.0)
    return h


# ----------------------------------------------------------------------------
# Demo
# ----------------------------------------------------------------------------
if __name__ == "__main__":
    key = jax.random.PRNGKey(0)
    k_x, k_e, k_p, k_x2, k_e2, k_p2 = jax.random.split(key, 6)

    # ---- small graph: fused single-call path --------------------------------
    num_nodes, in_c, hid_c, out_c, num_edges = 64, 16, 32, 8, 256
    x = jax.random.normal(k_x, (num_nodes, in_c), jnp.float32)
    edge_index = jax.random.randint(k_e, (2, num_edges), 0, num_nodes,
                                    dtype=jnp.int32)
    params = init_graphsage_params(k_p, in_c, hid_c, out_c, num_layers=2)
    prepared = prepare_params(params)

    out = jax.block_until_ready(graphsage_forward(prepared, x, edge_index))
    assert out.shape == (num_nodes, out_c)
    assert jnp.all(jnp.isfinite(out))
    ref = graphsage_reference(params, x, edge_index)
    err = float(jnp.max(jnp.abs(out - ref)) / (jnp.max(jnp.abs(ref)) + 1e-6))
    assert err < 5e-2, f"fused path error too large: {err}"

    # ---- larger graph: tiled (parallel rows x arbitrary reduction) path -----
    n2, in2, hid2, out2c, e2 = 384, 48, 64, 24, 3000
    x2 = jax.random.normal(k_x2, (n2, in2), jnp.float32)
    edge_index2 = jax.random.randint(k_e2, (2, e2), 0, n2, dtype=jnp.int32)
    params2 = init_graphsage_params(k_p2, in2, hid2, out2c, num_layers=2)
    prepared2 = prepare_params(params2)

    out2 = jax.block_until_ready(
        graphsage_forward(prepared2, x2, edge_index2, force_tiled=True))
    assert out2.shape == (n2, out2c)
    assert jnp.all(jnp.isfinite(out2))
    ref2 = graphsage_reference(params2, x2, edge_index2)
    err2 = float(jnp.max(jnp.abs(out2 - ref2)) / (jnp.max(jnp.abs(ref2)) + 1e-6))
    assert err2 < 5e-2, f"tiled path error too large: {err2}"

    # ---- same graph, artificially tight budget: exercises multi-tile K
    # reduction, resident-Z dynamic slicing and both accumulator variants.
    out3 = jax.block_until_ready(
        graphsage_forward(prepared2, x2, edge_index2, force_tiled=True,
                          vmem_budget_bytes=512 * 1024))
    err3 = float(jnp.max(jnp.abs(out3 - ref2)) / (jnp.max(jnp.abs(ref2)) + 1e-6))
    assert err3 < 5e-2, f"tight-budget tiled path error too large: {err3}"

    print("KERNEL_OK")
</pallas_src>

<mosaic_0001>
module attributes {stable_mosaic.version = 11 : i64} {
  func.func @_fused_sage_kernel(%arg0: i32, %arg1: memref<128x128xbf16, #tpu.memory_space<vmem>>, %arg2: memref<128x128xbf16, #tpu.memory_space<vmem>>, %arg3: memref<128x256xbf16, #tpu.memory_space<vmem>>, %arg4: memref<1x128xf32, #tpu.memory_space<vmem>>, %arg5: memref<128x256xbf16, #tpu.memory_space<vmem>>, %arg6: memref<1x128xf32, #tpu.memory_space<vmem>>, %arg7: memref<128x128xf32, #tpu.memory_space<vmem>>) attributes {dimension_semantics = [#tpu.dimension_semantics<arbitrary>], iteration_bounds = array<i64: 1>, scalar_prefetch = 0 : i64, scratch_operands = 0 : i64, tpu.core_type = #tpu.core_type<tc>, window_params = [{pipeline_mode = #tpu.pipeline_mode<synchronous>, transform_indices = @transform_0, window_bounds = array<i64: 128, 128>}, {pipeline_mode = #tpu.pipeline_mode<synchronous>, transform_indices = @transform_1, window_bounds = array<i64: 128, 128>}, {pipeline_mode = #tpu.pipeline_mode<synchronous>, transform_indices = @transform_2, window_bounds = array<i64: 128, 256>}, {pipeline_mode = #tpu.pipeline_mode<synchronous>, transform_indices = @transform_3, window_bounds = array<i64: 1, 128>}, {pipeline_mode = #tpu.pipeline_mode<synchronous>, transform_indices = @transform_4, window_bounds = array<i64: 128, 256>}, {pipeline_mode = #tpu.pipeline_mode<synchronous>, transform_indices = @transform_5, window_bounds = array<i64: 1, 128>}, {pipeline_mode = #tpu.pipeline_mode<synchronous>, transform_indices = @transform_6, window_bounds = array<i64: 128, 128>}]} {
    %c0 = arith.constant 0 : index
    %c0_0 = arith.constant 0 : index
    %0 = vector.load %arg1[%c0, %c0_0] : memref<128x128xbf16, #tpu.memory_space<vmem>>, vector<128x128xbf16>
    %c0_1 = arith.constant 0 : index
    %c0_2 = arith.constant 0 : index
    %1 = vector.load %arg2[%c0_1, %c0_2] : memref<128x128xbf16, #tpu.memory_space<vmem>>, vector<128x128xbf16>
    %c0_3 = arith.constant 0 : index
    %c0_4 = arith.constant 0 : index
    %2 = vector.load %arg3[%c0_3, %c0_4] : memref<128x256xbf16, #tpu.memory_space<vmem>>, vector<128x256xbf16>
    %cst = arith.constant dense<0.000000e+00> : vector<128x256xf32>
    %3 = tpu.matmul %1, %2, %cst {dimension_numbers = #tpu.dot_dimension_numbers<[1], [0], [0], [1], [0, 0, 1, 1], [], []>} : vector<128x128xbf16>, vector<128x256xbf16>, vector<128x256xf32> -> vector<128x256xf32>
    %4 = vector.extract_strided_slice %3 {offsets = [0, 0], sizes = [128, 128], strides = [1, 1]} : vector<128x256xf32> to vector<128x128xf32>
    %5 = arith.truncf %4 : vector<128x128xf32> to vector<128x128xbf16>
    %cst_5 = arith.constant dense<0.000000e+00> : vector<128x128xf32>
    %6 = tpu.matmul %0, %5, %cst_5 {dimension_numbers = #tpu.dot_dimension_numbers<[1], [0], [0], [1], [0, 0, 1, 1], [], []>} : vector<128x128xbf16>, vector<128x128xbf16>, vector<128x128xf32> -> vector<128x128xf32>
    %7 = vector.extract_strided_slice %3 {offsets = [0, 128], sizes = [128, 128], strides = [1, 1]} : vector<128x256xf32> to vector<128x128xf32>
    %8 = arith.addf %6, %7 : vector<128x128xf32>
    %c0_6 = arith.constant 0 : index
    %c0_7 = arith.constant 0 : index
    %9 = vector.load %arg4[%c0_6, %c0_7] : memref<1x128xf32, #tpu.memory_space<vmem>>, vector<1x128xf32>
    %10 = vector.broadcast %9 : vector<1x128xf32> to vector<128x128xf32>
    %11 = arith.addf %8, %10 : vector<128x128xf32>
    %cst_8 = arith.constant 0.000000e+00 : f32
    %12 = vector.broadcast %cst_8 : f32 to vector<128x128xf32>
    %13 = arith.maximumf %11, %12 : vector<128x128xf32>
    %14 = arith.truncf %13 : vector<128x128xf32> to vector<128x128xbf16>
    %c0_9 = arith.constant 0 : index
    %c0_10 = arith.constant 0 : index
    %15 = vector.load %arg5[%c0_9, %c0_10] : memref<128x256xbf16, #tpu.memory_space<vmem>>, vector<128x256xbf16>
    %cst_11 = arith.constant dense<0.000000e+00> : vector<128x256xf32>
    %16 = tpu.matmul %14, %15, %cst_11 {dimension_numbers = #tpu.dot_dimension_numbers<[1], [0], [0], [1], [0, 0, 1, 1], [], []>} : vector<128x128xbf16>, vector<128x256xbf16>, vector<128x256xf32> -> vector<128x256xf32>
    %17 = vector.extract_strided_slice %16 {offsets = [0, 0], sizes = [128, 128], strides = [1, 1]} : vector<128x256xf32> to vector<128x128xf32>
    %18 = arith.truncf %17 : vector<128x128xf32> to vector<128x128xbf16>
    %cst_12 = arith.constant dense<0.000000e+00> : vector<128x128xf32>
    %19 = tpu.matmul %0, %18, %cst_12 {dimension_numbers = #tpu.dot_dimension_numbers<[1], [0], [0], [1], [0, 0, 1, 1], [], []>} : vector<128x128xbf16>, vector<128x128xbf16>, vector<128x128xf32> -> vector<128x128xf32>
    %20 = vector.extract_strided_slice %16 {offsets = [0, 128], sizes = [128, 128], strides = [1, 1]} : vector<128x256xf32> to vector<128x128xf32>
    %21 = arith.addf %19, %20 : vector<128x128xf32>
    %c0_13 = arith.constant 0 : index
    %c0_14 = arith.constant 0 : index
    %22 = vector.load %arg6[%c0_13, %c0_14] : memref<1x128xf32, #tpu.memory_space<vmem>>, vector<1x128xf32>
    %23 = vector.broadcast %22 : vector<1x128xf32> to vector<128x128xf32>
    %24 = arith.addf %21, %23 : vector<128x128xf32>
    %c0_15 = arith.constant 0 : index
    %c0_16 = arith.constant 0 : index
    %25 = vector.load %arg7[%c0_15, %c0_16] : memref<128x128xf32, #tpu.memory_space<vmem>>, vector<128x128xf32>
    tpu.vector_store %arg7[%c0_15, %c0_16], %24 {strides = array<i32>} : memref<128x128xf32, #tpu.memory_space<vmem>>, vector<128x128xf32>,
    return
  }
  func.func @transform_0(%arg0: i32) -> (i32, i32) {
    %c0_i32 = arith.constant 0 : i32
    %c0_i32_0 = arith.constant 0 : i32
    %c0_i32_1 = arith.constant 0 : i32
    return %c0_i32, %c0_i32_0 : i32, i32
  }
  func.func @transform_1(%arg0: i32) -> (i32, i32) {
    %c0_i32 = arith.constant 0 : i32
    %c0_i32_0 = arith.constant 0 : i32
    %c0_i32_1 = arith.constant 0 : i32
    return %c0_i32, %c0_i32_0 : i32, i32
  }
  func.func @transform_2(%arg0: i32) -> (i32, i32) {
    %c0_i32 = arith.constant 0 : i32
    %c0_i32_0 = arith.constant 0 : i32
    %c0_i32_1 = arith.constant 0 : i32
    return %c0_i32, %c0_i32_0 : i32, i32
  }
  func.func @transform_3(%arg0: i32) -> (i32, i32) {
    %c0_i32 = arith.constant 0 : i32
    %c0_i32_0 = arith.constant 0 : i32
    %c0_i32_1 = arith.constant 0 : i32
    return %c0_i32, %c0_i32_0 : i32, i32
  }
  func.func @transform_4(%arg0: i32) -> (i32, i32) {
    %c0_i32 = arith.constant 0 : i32
    %c0_i32_0 = arith.constant 0 : i32
    %c0_i32_1 = arith.constant 0 : i32
    return %c0_i32, %c0_i32_0 : i32, i32
  }
  func.func @transform_5(%arg0: i32) -> (i32, i32) {
    %c0_i32 = arith.constant 0 : i32
    %c0_i32_0 = arith.constant 0 : i32
    %c0_i32_1 = arith.constant 0 : i32
    return %c0_i32, %c0_i32_0 : i32, i32
  }
  func.func @transform_6(%arg0: i32) -> (i32, i32) {
    %c0_i32 = arith.constant 0 : i32
    %c0_i32_0 = arith.constant 0 : i32
    %c0_i32_1 = arith.constant 0 : i32
    return %c0_i32, %c0_i32_0 : i32, i32
  }
}

</mosaic_0001>

<bundles_post_ra>
// kernel: tpu_custom_call.1
= control target key start
LH: loop header
LB: loop body
LE: loop exit
PB: predicated region body
PF: predicated region fallthrough
CT: control target
= control target key end

     0   :  { %11 = vsyncpa [#allocation3], 0  ;;  %s1567_s0 = inlined_call_operand.hbm [shape: bf16[128,128], index: 0, kind: input, shape index: {}]   ;;  %s1568_s1 = inlined_call_operand.hbm [shape: bf16[128,128], index: 1, kind: input, shape index: {}]   ;;  %s1569_s2 = inlined_call_operand.hbm [shape: bf16[128,256], index: 2, kind: input, shape index: {}]   ;;  %s1570_s3 = inlined_call_operand.vmem [shape: f32[1,128], index: 3, kind: input, shape index: {}]   ;;  %s1571_s4 = inlined_call_operand.hbm [shape: bf16[128,256], index: 4, kind: input, shape index: {}]   ;;  %s1572_s5 = inlined_call_operand.vmem [shape: f32[1,128], index: 5, kind: input, shape index: {}]   ;;  %s1573_s6 = inlined_call_operand.hbm [shape: f32[128,128], index: 6, kind: output, shape index: {}]  }
   0x1   :  { %12 = vsyncpa [#allocation6], 0 }
   0x2   :  { %13 = vsyncpa [#allocation9], 0 }
   0x3   :  { %14 = vsyncpa [#allocation4], 0  ;;  %s1279_s21 = smov [#allocation5]   ;;  %s1280_s23 = smov [#allocation2]  }
   0x4   :  { %s32_s22 = sshll.u32 %s1279_s21, 4  ;;  %s20_s24 = sshll.u32 %s1280_s23, 4  ;;  %s33_s22 = int_to_ptr.vmem [resolvable:$true] %s32_s22  ;;  %s1324_s24 = int_to_ptr.vmem [resolvable:$true] %s20_s24 }
   0x5   :  { %s1161_s27 = scalar_lea.hbm %s1568_s1, 1024 }
   0x6   :  { %p1162_p0 = scmp.ne.s32.totalorder %s1568_s1, %s1161_s27  ;;  %p1165_p1 = scmp.lt.u32.totalorder %s1161_s27, %s1568_s1 }
   0x8   :  { %p1167_p2 = pnand %p1165_p1, %p1162_p0 }
   0xa   :  { %1170 = shalt.err (!%p1167_p2)
}
   0xb   :  { %s1171_s8 = scalar_lea.vmem %s33_s22, 1024  ;;  %p1176_p4 = scmp.lt.s32.totalorder %s33_s22, %s33_s22 }
   0xc   :  { %p1172_p3 = scmp.ne.s32.totalorder %s33_s22, %s1171_s8  ;;  %p1177_p5 = scmp.lt.s32.totalorder %s1171_s8, %s1171_s8 }
   0xe   :  { %p1178_p6 = por %p1177_p5, %p1176_p4 }
  0x10   :  { %p1179_p7 = pnand %p1178_p6, %p1172_p3 }
  0x12   :  { %1182 = shalt.err (!%p1179_p7)
}
  0x13   :  { %s1281_s9 = smov 64   ;;  %s1282_s10 = smov 4  }
  0x14   :  { %38 = dma.hbm_to_vmem [thread:$0]  %s1568_s1, 1024, %s33_s22, [#allocation6], %s1281_s9, %s1281_s9, %s1282_s10  }
  0x15   :  { %s1183_s15 = scalar_lea.hbm %s1567_s0, 1024 }
  0x16   :  { %p1184_p8 = scmp.ne.s32.totalorder %s1567_s0, %s1183_s15  ;;  %p1187_p9 = scmp.lt.u32.totalorder %s1183_s15, %s1567_s0 }
  0x18   :  { %p1189_p10 = pnand %p1187_p9, %p1184_p8 }
  0x1a   :  { %1192 = shalt.err (!%p1189_p10)
}
  0x1b   :  { %s1193_s20 = scalar_lea.vmem %s1324_s24, 1024  ;;  %p1198_p12 = scmp.lt.s32.totalorder %s1324_s24, %s1324_s24 }
  0x1c   :  { %p1194_p11 = scmp.ne.s32.totalorder %s1324_s24, %s1193_s20  ;;  %p1199_p13 = scmp.lt.s32.totalorder %s1193_s20, %s1193_s20 }
  0x1e   :  { %p1200_p0 = por %p1199_p13, %p1198_p12 }
  0x20   :  { %p1201_p1 = pnand %p1200_p0, %p1194_p11 }
  0x22   :  { %1204 = shalt.err (!%p1201_p1)
}
  0x23   :  { %26 = dma.hbm_to_vmem [thread:$0]  %s1567_s0, 1024, %s1324_s24, [#allocation3], %s1281_s9, %s1281_s9, %s1282_s10  }
  0x24   :  { %s1283_s22 = smov [#allocation7]   ;;  %s1205_s27 = scalar_lea.hbm %s1569_s2, 2048 }
  0x25   :  { %s44_s23 = sshll.u32 %s1283_s22, 4  ;;  %p1206_p2 = scmp.ne.s32.totalorder %s1569_s2, %s1205_s27  ;;  %s45_s23 = int_to_ptr.vmem [resolvable:$true] %s44_s23 }
  0x26   :  { %p1209_p3 = scmp.lt.u32.totalorder %s1205_s27, %s1569_s2 }
  0x28   :  { %p1211_p4 = pnand %p1209_p3, %p1206_p2 }
  0x2a   :  { %1214 = shalt.err (!%p1211_p4)
}
  0x2b   :  { %s1215_s8 = scalar_lea.vmem %s45_s23, 2048  ;;  %p1220_p6 = scmp.lt.s32.totalorder %s45_s23, %s45_s23 }
  0x2c   :  { %p1216_p5 = scmp.ne.s32.totalorder %s45_s23, %s1215_s8  ;;  %p1221_p7 = scmp.lt.s32.totalorder %s1215_s8, %s1215_s8 }
  0x2e   :  { %p1222_p8 = por %p1221_p7, %p1220_p6 }
  0x30   :  { %p1223_p9 = pnand %p1222_p8, %p1216_p5 }
  0x32   :  { %1226 = shalt.err (!%p1223_p9)
}
  0x33   :  { %s1284_s0 = smov 128   ;;  %s1285_s24 = smov 8  }
  0x34   :  { %50 = dma.hbm_to_vmem [thread:$0]  %s1569_s2, 2048, %s45_s23, [#allocation6], %s1284_s0, %s1284_s0, %s1285_s24  }
  0x35   :  { %s1286_s11 = smov [#allocation8]   ;;  %s1227_s15 = scalar_lea.hbm %s1571_s4, 2048 }
  0x36   :  { %s58_s12 = sshll.u32 %s1286_s11, 4  ;;  %p1228_p10 = scmp.ne.s32.totalorder %s1571_s4, %s1227_s15  ;;  %s59_s12 = int_to_ptr.vmem [resolvable:$true] %s58_s12 }
  0x37   :  { %p1231_p11 = scmp.lt.u32.totalorder %s1227_s15, %s1571_s4 }
  0x39   :  { %p1233_p12 = pnand %p1231_p11, %p1228_p10 }
  0x3b   :  { %1236 = shalt.err (!%p1233_p12)
}
  0x3c   :  { %s1237_s20 = scalar_lea.vmem %s59_s12, 2048  ;;  %p1242_p0 = scmp.lt.s32.totalorder %s59_s12, %s59_s12 }
  0x3d   :  { %p1238_p13 = scmp.ne.s32.totalorder %s59_s12, %s1237_s20  ;;  %p1243_p1 = scmp.lt.s32.totalorder %s1237_s20, %s1237_s20 }
  0x3f   :  { %p1244_p2 = por %p1243_p1, %p1242_p0 }
  0x41   :  { %p1245_p3 = pnand %p1244_p2, %p1238_p13 }
  0x43   :  { %1248 = shalt.err (!%p1245_p3)
}
  0x44   :  { %64 = dma.hbm_to_vmem [thread:$0]  %s1571_s4, 2048, %s59_s12, [#allocation9], %s1284_s0, %s1284_s0, %s1285_s24  }
  0x45   :  { %1271 = dma.done.wait [#allocation3], 1024  }
  0x46   :  { %1272 = vsyncadd [#allocation3], 4294966272 }
  0x47   :  { %1273 = dma.done.wait [#allocation6], 3072  }
  0x48   :  { %1274 = vsyncadd [#allocation6], 4294964224 }
  0x49   :  { %1275 = dma.done.wait [#allocation9], 2048  }
  0x4a   :  { %1276 = vsyncadd [#allocation9], 4294965248  ;;  %v1287_v0 = vmov 0   ;;  %v1097_v1 = vld [vmem:[#allocation7 + $0x4] ss:$8 sps:$4 sm:$0xff]   ;;  %v1123_v19 = vld [vmem:[#allocation5 + $0x10] sm:$0xff]  }
  0x4b   :  { %288 = vmatprep.mubr.bf16.mxu0 %v1287_v0  ;;  %v1099_v2 = vld [vmem:[#allocation7] ss:$8 sps:$4 sm:$0xff]   ;;  %256 = vmatprep.subr.bf16.mxu0 %v1097_v1  ;;  %v1100_v3 = vld [vmem:[#allocation7 + $0x14] ss:$8 sps:$4 sm:$0xff]   ;;  %v1102_v4 = vld [vmem:[#allocation7 + $0x10] ss:$8 sps:$4 sm:$0xff]  }
  0x4c   :  { %257 = vmatpush1.bf16.msra.mxu0 %v1099_v2  ;;  %v1103_v5 = vld [vmem:[#allocation7 + $0x24] ss:$8 sps:$4 sm:$0xff]   ;;  %v1105_v6 = vld [vmem:[#allocation7 + $0x20] ss:$8 sps:$4 sm:$0xff]   ;;  %v1106_v7 = vld [vmem:[#allocation7 + $0x34] ss:$8 sps:$4 sm:$0xff]  }
  0x4d   :  { %258 = vmatprep.subr.bf16.mxu0 %v1100_v3  ;;  %v1108_v8 = vld [vmem:[#allocation7 + $0x30] ss:$8 sps:$4 sm:$0xff]   ;;  %v1109_v9 = vld [vmem:[#allocation7 + $0x44] ss:$8 sps:$4 sm:$0xff]   ;;  %v1111_v10 = vld [vmem:[#allocation7 + $0x40] ss:$8 sps:$4 sm:$0xff]  }
  0x4e   :  { %v1112_v11 = vld [vmem:[#allocation7 + $0x54] ss:$8 sps:$4 sm:$0xff]   ;;  %v1114_v12 = vld [vmem:[#allocation7 + $0x50] ss:$8 sps:$4 sm:$0xff]   ;;  %v1115_v13 = vld [vmem:[#allocation7 + $0x64] ss:$8 sps:$4 sm:$0xff]  }
  0x4f   :  { %v1117_v14 = vld [vmem:[#allocation7 + $0x60] ss:$8 sps:$4 sm:$0xff]   ;;  %v1118_v15 = vld [vmem:[#allocation7 + $0x74] ss:$8 sps:$4 sm:$0xff]   ;;  %v1120_v16 = vld [vmem:[#allocation7 + $0x70] ss:$8 sps:$4 sm:$0xff]  }
  0x50   :  { %259 = vmatpush1.bf16.msra.mxu0 %v1102_v4  ;;  %v1121_v17 = vld [vmem:[#allocation5] sm:$0xff]   ;;  %v1122_v18 = vld [vmem:[#allocation5 + $0x8] sm:$0xff]   ;;  %v1124_v20 = vld [vmem:[#allocation5 + $0x18] sm:$0xff]  }
  0x51   :  { %260 = vmatprep.subr.bf16.mxu0 %v1103_v5  ;;  %v1125_v21 = vld [vmem:[#allocation5 + $0x20] sm:$0xff]   ;;  %v1126_v22 = vld [vmem:[#allocation5 + $0x28] sm:$0xff]   ;;  %v1127_v23 = vld [vmem:[#allocation5 + $0x30] sm:$0xff]  }
  0x52   :  { %v1128_v24 = vld [vmem:[#allocation5 + $0x38] sm:$0xff]   ;;  %v1129_v25 = vld [vmem:[#allocation2] sm:$0xff]   ;;  %v1425_v4 = vld [vmem:[#allocation2 + $0x8] sm:$0xff]  }
  0x53   :  { %1039 = vmatprep.mubr.bf16.mxu1 %v1129_v25  ;;  %v1139_v3 = vld [vmem:[#allocation8 + $0x4] ss:$8 sps:$4 sm:$0xff]   ;;  %v1427_v5 = vld [vmem:[#allocation2 + $0x10] sm:$0xff]  }
  0x54   :  { %261 = vmatpush1.bf16.msra.mxu0 %v1105_v6  ;;  %v1137_v6 = vld [vmem:[#allocation8] ss:$8 sps:$4 sm:$0xff]  }
  0x55   :  { %262 = vmatprep.subr.bf16.mxu0 %v1106_v7  ;;  %v1142_v7 = vld [vmem:[#allocation8 + $0x14] ss:$8 sps:$4 sm:$0xff]  }
  0x58   :  { %263 = vmatpush1.bf16.msra.mxu0 %v1108_v8  ;;  %v1140_v8 = vld [vmem:[#allocation8 + $0x10] ss:$8 sps:$4 sm:$0xff]  }
  0x59   :  { %264 = vmatprep.subr.bf16.mxu0 %v1109_v9  ;;  %v1145_v9 = vld [vmem:[#allocation8 + $0x24] ss:$8 sps:$4 sm:$0xff]  }
  0x5c   :  { %265 = vmatpush1.bf16.msra.mxu0 %v1111_v10  ;;  %v1431_v10 = vld [vmem:[#allocation2 + $0x18] sm:$0xff]  }
  0x5d   :  { %266 = vmatprep.subr.bf16.mxu0 %v1112_v11  ;;  %v1433_v11 = vld [vmem:[#allocation2 + $0x20] sm:$0xff]  }
  0x60   :  { %267 = vmatpush1.bf16.msra.mxu0 %v1114_v12  ;;  %v1143_v12 = vld [vmem:[#allocation8 + $0x20] ss:$8 sps:$4 sm:$0xff]  }
  0x61   :  { %268 = vmatprep.subr.bf16.mxu0 %v1115_v13  ;;  %v1148_v13 = vld [vmem:[#allocation8 + $0x34] ss:$8 sps:$4 sm:$0xff]  }
  0x64   :  { %269 = vmatpush1.bf16.msra.mxu0 %v1117_v14  ;;  %v1146_v14 = vld [vmem:[#allocation8 + $0x30] ss:$8 sps:$4 sm:$0xff]  }
  0x65   :  { %270 = vmatprep.subr.bf16.mxu0 %v1118_v15  ;;  %v1151_v15 = vld [vmem:[#allocation8 + $0x44] ss:$8 sps:$4 sm:$0xff]  }
  0x68   :  { %271 = vmatpush1.bf16.msra.mxu0 %v1120_v16  ;;  %v1437_v16 = vld [vmem:[#allocation2 + $0x28] sm:$0xff]  }
  0x6b   :  { %289 = vmatmul.mubr.bf16.vlgmr.msra.gmra.mrb[0].mxu0 %v1121_v17  ;;  %v1439_v17 = vld [vmem:[#allocation2 + $0x30] sm:$0xff]  }
  0x6c   :  { %298 = vmatprep.mubr.bf16.mxu0 %v1287_v0 }
  0x73   :  { %299 = vmatmul.mubr.bf16.gmra.mrb[4].mxu0 %v1122_v18  ;;  %v1149_v18 = vld [vmem:[#allocation8 + $0x40] ss:$8 sps:$4 sm:$0xff]  }
  0x74   :  { %308 = vmatprep.mubr.bf16.mxu0 %v1287_v0 }
  0x7b   :  { %309 = vmatmul.mubr.bf16.gmra.mrb[8].mxu0 %v1123_v19  ;;  %v1443_v19 = vld [vmem:[#allocation2 + $0x38] sm:$0xff]  }
  0x7c   :  { %318 = vmatprep.mubr.bf16.mxu0 %v1287_v0 }
  0x83   :  { %319 = vmatmul.mubr.bf16.gmra.mrb[12].mxu0 %v1124_v20  ;;  %v1154_v20 = vld [vmem:[#allocation8 + $0x54] ss:$8 sps:$4 sm:$0xff]  }
  0x84   :  { %328 = vmatprep.mubr.bf16.mxu0 %v1287_v0 }
  0x8b   :  { %329 = vmatmul.mubr.bf16.gmra.mrb[16].mxu0 %v1125_v21  ;;  %v1152_v21 = vld [vmem:[#allocation8 + $0x50] ss:$8 sps:$4 sm:$0xff]  }
  0x8c   :  { %338 = vmatprep.mubr.bf16.mxu0 %v1287_v0 }
  0x93   :  { %339 = vmatmul.mubr.bf16.gmra.mrb[20].mxu0 %v1126_v22  ;;  %v1157_v22 = vld [vmem:[#allocation8 + $0x64] ss:$8 sps:$4 sm:$0xff]  }
  0x94   :  { %348 = vmatprep.mubr.bf16.mxu0 %v1287_v0 }
  0x9b   :  { %349 = vmatmul.mubr.bf16.gmra.mrb[24].mxu0 %v1127_v23  ;;  %v1155_v23 = vld [vmem:[#allocation8 + $0x60] ss:$8 sps:$4 sm:$0xff]  }
  0x9c   :  { %358 = vmatprep.mubr.bf16.mxu0 %v1287_v0 }
  0xa3   :  { %359 = vmatmul.mubr.bf16.gmra.mrb[28].mxu0 %v1128_v24  ;;  %v1160_v24 = vld [vmem:[#allocation8 + $0x74] ss:$8 sps:$4 sm:$0xff]  }
  0xa4   :  { %1071 = vmatprep.mubr.bf16.mxu0 %v1129_v25  ;;  %v1158_v25 = vld [vmem:[#allocation8 + $0x70] ss:$8 sps:$4 sm:$0xff]  }
 0x13e   :  { %v290_v26 = vpop.f32.mrb[0].mxu0 }
 0x13f   :  { %v1393_v27 = vpop.f32.mrb[1].mxu0 }
 0x140   :  { %v294_v28 = vpop.f32.mrb[2].mxu0 }
 0x141   :  { %v369_v29 = vpack.c.bf16 %v294_v28, %v290_v26  ;;  %v1395_v30 = vpop.f32.mrb[3].mxu0  ;;  %v1450_v28 = vld [vmem:[%s1570_s3] ss:$0 sm:$0xff] }
 0x143   :  { %1023 = vmatprep.subr.bf16.mxu1 %v369_v29 }
 0x144   :  { %1024 = vmatpush3.bf16.msra.mxu1 %v369_v29 }
 0x146   :  { %v300_v31 = vpop.f32.mrb[4].mxu0 }
 0x147   :  { %v1397_v32 = vpop.f32.mrb[5].mxu0 }
 0x148   :  { %v304_v33 = vpop.f32.mrb[6].mxu0 }
 0x149   :  { %v370_v34 = vpack.c.bf16 %v304_v33, %v300_v31  ;;  %v1399_v35 = vpop.f32.mrb[7].mxu0 }
 0x14b   :  { %1025 = vmatprep.subr.bf16.mxu1 %v370_v34 }
 0x14c   :  { %1026 = vmatpush3.bf16.msra.mxu1 %v370_v34 }
 0x14e   :  { %v310_v36 = vpop.f32.mrb[8].mxu0 }
 0x14f   :  { %v1401_v37 = vpop.f32.mrb[9].mxu0 }
 0x150   :  { %v314_v38 = vpop.f32.mrb[10].mxu0 }
 0x151   :  { %v371_v39 = vpack.c.bf16 %v314_v38, %v310_v36  ;;  %v1403_v40 = vpop.f32.mrb[11].mxu0 }
 0x153   :  { %1027 = vmatprep.subr.bf16.mxu1 %v371_v39 }
 0x154   :  { %1028 = vmatpush3.bf16.msra.mxu1 %v371_v39 }
 0x156   :  { %v320_v41 = vpop.f32.mrb[12].mxu0 }
 0x157   :  { %v1405_v42 = vpop.f32.mrb[13].mxu0 }
 0x158   :  { %v324_v43 = vpop.f32.mrb[14].mxu0 }
 0x159   :  { %v372_v44 = vpack.c.bf16 %v324_v43, %v320_v41  ;;  %v1407_v45 = vpop.f32.mrb[15].mxu0 }
 0x15b   :  { %1029 = vmatprep.subr.bf16.mxu1 %v372_v44 }
 0x15c   :  { %1030 = vmatpush3.bf16.msra.mxu1 %v372_v44 }
 0x15e   :  { %v330_v46 = vpop.f32.mrb[16].mxu0 }
 0x15f   :  { %v1409_v47 = vpop.f32.mrb[17].mxu0 }
 0x160   :  { %v334_v48 = vpop.f32.mrb[18].mxu0 }
 0x161   :  { %v373_v49 = vpack.c.bf16 %v334_v48, %v330_v46  ;;  %v1411_v50 = vpop.f32.mrb[19].mxu0 }
 0x163   :  { %1031 = vmatprep.subr.bf16.mxu1 %v373_v49 }
 0x164   :  { %1032 = vmatpush3.bf16.msra.mxu1 %v373_v49 }
 0x166   :  { %v340_v51 = vpop.f32.mrb[20].mxu0 }
 0x167   :  { %v1413_v52 = vpop.f32.mrb[21].mxu0 }
 0x168   :  { %v344_v53 = vpop.f32.mrb[22].mxu0 }
 0x169   :  { %v374_v54 = vpack.c.bf16 %v344_v53, %v340_v51  ;;  %v1415_v55 = vpop.f32.mrb[23].mxu0 }
 0x16b   :  { %1033 = vmatprep.subr.bf16.mxu1 %v374_v54 }
 0x16c   :  { %1034 = vmatpush3.bf16.msra.mxu1 %v374_v54 }
 0x16e   :  { %v350_v56 = vpop.f32.mrb[24].mxu0 }
 0x16f   :  { %v1417_v57 = vpop.f32.mrb[25].mxu0 }
 0x170   :  { %v354_v58 = vpop.f32.mrb[26].mxu0 }
 0x171   :  { %v375_v59 = vpack.c.bf16 %v354_v58, %v350_v56  ;;  %v1419_v60 = vpop.f32.mrb[27].mxu0 }
 0x173   :  { %1035 = vmatprep.subr.bf16.mxu1 %v375_v59 }
 0x174   :  { %1036 = vmatpush3.bf16.msra.mxu1 %v375_v59 }
 0x176   :  { %v360_v61 = vpop.f32.mrb[28].mxu0 }
 0x177   :  { %v1421_v62 = vpop.f32.mrb[29].mxu0 }
 0x178   :  { %v364_v63 = vpop.f32.mrb[30].mxu0 }
 0x179   :  { %v376_v1 = vpack.c.bf16 %v364_v63, %v360_v61  ;;  %v1423_v2 = vpop.f32.mrb[31].mxu0 }
 0x17b   :  { %1037 = vmatprep.subr.bf16.mxu1 %v376_v1 }
 0x17c   :  { %1038 = vmatpush3.bf16.msra.mxu1 %v376_v1 }
 0x17d   :  { %665 = vmatprep.subr.bf16.mxu1 %v1139_v3 }
 0x17f   :  { %1040 = vmatmul.mubr.bf16.vlgmr.msra.gmra.mrb[0].mxu1 %v1425_v4 }
 0x180   :  { %1043 = vmatprep.mubr.bf16.mxu1 %v1427_v5  ;;  %666 = vmatpush1.bf16.msra.mxu1 %v1137_v6 }
 0x181   :  { %667 = vmatprep.subr.bf16.mxu1 %v1142_v7 }
 0x184   :  { %668 = vmatpush1.bf16.msra.mxu1 %v1140_v8 }
 0x185   :  { %669 = vmatprep.subr.bf16.mxu1 %v1145_v9 }
 0x187   :  { %1044 = vmatmul.mubr.bf16.gmra.mrb[4].mxu1 %v1431_v10 }
 0x188   :  { %1047 = vmatprep.mubr.bf16.mxu1 %v1433_v11  ;;  %670 = vmatpush1.bf16.msra.mxu1 %v1143_v12 }
 0x189   :  { %671 = vmatprep.subr.bf16.mxu1 %v1148_v13 }
 0x18c   :  { %672 = vmatpush1.bf16.msra.mxu1 %v1146_v14 }
 0x18d   :  { %673 = vmatprep.subr.bf16.mxu1 %v1151_v15 }
 0x18f   :  { %1048 = vmatmul.mubr.bf16.gmra.mrb[8].mxu1 %v1437_v16 }
 0x190   :  { %1051 = vmatprep.mubr.bf16.mxu1 %v1439_v17  ;;  %674 = vmatpush1.bf16.msra.mxu1 %v1149_v18 }
 0x191   :  { %675 = vmatprep.subr.bf16.mxu1 %v1154_v20 }
 0x194   :  { %676 = vmatpush1.bf16.msra.mxu1 %v1152_v21 }
 0x195   :  { %677 = vmatprep.subr.bf16.mxu1 %v1157_v22 }
 0x197   :  { %1052 = vmatmul.mubr.bf16.gmra.mrb[12].mxu1 %v1443_v19 }
 0x198   :  { %697 = vmatprep.mubr.bf16.mxu1 %v1287_v0  ;;  %678 = vmatpush1.bf16.msra.mxu1 %v1155_v23 }
 0x199   :  { %679 = vmatprep.subr.bf16.mxu1 %v1160_v24 }
 0x19c   :  { %680 = vmatpush1.bf16.msra.mxu1 %v1158_v25 }
 0x252   :  { %v1041_v26 = vpop.f32.mrb[0].mxu1 }
 0x253   :  { %v468_v29 = vadd.f32 %v1041_v26, %v1397_v32  ;;  %v459_v31 = vpop.f32.mrb[1].mxu1 }
 0x254   :  { %v460_v33 = vadd.f32 %v459_v31, %v1393_v27  ;;  %v1042_v34 = vpop.f32.mrb[2].mxu1 }
 0x255   :  { %v531_v36 = vadd.f32 %v1450_v28, %v468_v29  ;;  %v471_v38 = vadd.f32 %v1042_v34, %v1399_v35  ;;  %v462_v39 = vpop.f32.mrb[3].mxu1 }
 0x256   :  { %v529_v41 = vadd.f32 %v1450_v28, %v460_v33  ;;  %v463_v43 = vadd.f32 %v462_v39, %v1395_v30 }
 0x257   :  { %v532_v44 = vadd.f32 %v1450_v28, %v471_v38  ;;  %v547_v48 = vmax.f32 %v531_v36, 0.0 }
 0x258   :  { %v530_v46 = vadd.f32 %v1450_v28, %v463_v43  ;;  %v545_v32 = vmax.f32 %v529_v41, 0.0 }
 0x259   :  { %v548_v49 = vmax.f32 %v532_v44, 0.0 }
 0x25a   :  { %v546_v51 = vmax.f32 %v530_v46, 0.0  ;;  %v1045_v53 = vpop.f32.mrb[4].mxu1 }
 0x25b   :  { %v484_v27 = vadd.f32 %v1045_v53, %v1405_v42  ;;  %v475_v54 = vpop.f32.mrb[5].mxu1  ;;  %v562_v56 = vpack.c.bf16 %v548_v49, %v547_v48 }
 0x25c   :  { %v561_v58 = vpack.c.bf16 %v546_v51, %v545_v32  ;;  %v476_v35 = vadd.f32 %v475_v54, %v1401_v37  ;;  %v1046_v59 = vpop.f32.mrb[6].mxu1 }
 0x25d   :  { %v535_v61 = vadd.f32 %v1450_v28, %v484_v27  ;;  %v487_v30 = vadd.f32 %v1046_v59, %v1407_v45  ;;  %v478_v63 = vpop.f32.mrb[7].mxu1 }
 0x25e   :  { %v533_v1 = vadd.f32 %v1450_v28, %v476_v35  ;;  %v479_v3 = vadd.f32 %v478_v63, %v1403_v40  ;;  %698 = vmatmul.mubr.bf16.vlgmr.msra.gmra.mrb[16].mxu1 %v561_v58 }
 0x25f   :  { %v536_v6 = vadd.f32 %v1450_v28, %v487_v30  ;;  %707 = vmatprep.mubr.bf16.mxu1 %v1287_v0  ;;  %v551_v7 = vmax.f32 %v535_v61, 0.0 }
 0x260   :  { %v534_v42 = vadd.f32 %v1450_v28, %v479_v3  ;;  %v549_v37 = vmax.f32 %v533_v1, 0.0 }
 0x261   :  { %v552_v8 = vmax.f32 %v536_v6, 0.0 }
 0x262   :  { %v550_v9 = vmax.f32 %v534_v42, 0.0  ;;  %v1049_v12 = vpop.f32.mrb[8].mxu1 }
 0x263   :  { %v500_v13 = vadd.f32 %v1049_v12, %v1413_v52  ;;  %v491_v45 = vpop.f32.mrb[9].mxu1  ;;  %v564_v14 = vpack.c.bf16 %v552_v8, %v551_v7 }
 0x264   :  { %v492_v15 = vadd.f32 %v491_v45, %v1409_v47  ;;  %v1050_v18 = vpop.f32.mrb[10].mxu1  ;;  %v563_v40 = vpack.c.bf16 %v550_v9, %v549_v37 }
 0x265   :  { %v539_v20 = vadd.f32 %v1450_v28, %v500_v13  ;;  %v503_v21 = vadd.f32 %v1050_v18, %v1415_v55  ;;  %v494_v22 = vpop.f32.mrb[11].mxu1 }
 0x266   :  { %v537_v23 = vadd.f32 %v1450_v28, %v492_v15  ;;  %v495_v24 = vadd.f32 %v494_v22, %v1411_v50  ;;  %708 = vmatmul.mubr.bf16.gmra.mrb[20].mxu1 %v562_v56 }
 0x267   :  { %v540_v25 = vadd.f32 %v1450_v28, %v503_v21  ;;  %717 = vmatprep.mubr.bf16.mxu1 %v1287_v0  ;;  %v555_v26 = vmax.f32 %v539_v20, 0.0 }
 0x268   :  { %v538_v52 = vadd.f32 %v1450_v28, %v495_v24  ;;  %v553_v29 = vmax.f32 %v537_v23, 0.0 }
 0x269   :  { %v556_v47 = vmax.f32 %v540_v25, 0.0 }
 0x26a   :  { %v554_v31 = vmax.f32 %v538_v52, 0.0  ;;  %v1053_v33 = vpop.f32.mrb[12].mxu1 }
 0x26b   :  { %v516_v34 = vadd.f32 %v1053_v33, %v1421_v62  ;;  %v507_v55 = vpop.f32.mrb[13].mxu1  ;;  %v566_v36 = vpack.c.bf16 %v556_v47, %v555_v26 }
 0x26c   :  { %v508_v38 = vadd.f32 %v507_v55, %v1417_v57  ;;  %v1054_v39 = vpop.f32.mrb[14].mxu1  ;;  %v565_v50 = vpack.c.bf16 %v554_v31, %v553_v29 }
 0x26d   :  { %v543_v41 = vadd.f32 %v1450_v28, %v516_v34  ;;  %v519_v43 = vadd.f32 %v1054_v39, %v1423_v2  ;;  %v510_v44 = vpop.f32.mrb[15].mxu1 }
 0x26e   :  { %v541_v46 = vadd.f32 %v1450_v28, %v508_v38  ;;  %v511_v48 = vadd.f32 %v510_v44, %v1419_v60  ;;  %718 = vmatmul.mubr.bf16.gmra.mrb[24].mxu1 %v563_v40  ;;  %v1523_v38 = vld [vmem:[%s1572_s5] ss:$0 sm:$0xff]  ;;  %s1288_s5 = smov [#allocation10]  }
 0x26f   :  { %v544_v49 = vadd.f32 %v1450_v28, %v519_v43  ;;  %727 = vmatprep.mubr.bf16.mxu1 %v1287_v0  ;;  %v559_v32 = vmax.f32 %v543_v41, 0.0  ;;  %s927_s23 = sshll.u32 %s1288_s5, 4  ;;  %s928_s23 = int_to_ptr.vmem [resolvable:$true] %s927_s23 }
 0x270   :  { %v542_v62 = vadd.f32 %v1450_v28, %v511_v48  ;;  %v557_v51 = vmax.f32 %v541_v46, 0.0  ;;  %s1249_s25 = scalar_lea.vmem %s928_s23, 2048  ;;  %p1254_p5 = scmp.lt.s32.totalorder %s928_s23, %s928_s23 }
 0x271   :  { %v560_v57 = vmax.f32 %v544_v49, 0.0  ;;  %p1250_p4 = scmp.ne.s32.totalorder %s928_s23, %s1249_s25  ;;  %p1255_p6 = scmp.lt.s32.totalorder %s1249_s25, %s1249_s25 }
 0x272   :  { %v558_v53 = vmax.f32 %v542_v62, 0.0 }
 0x273   :  { %v568_v27 = vpack.c.bf16 %v560_v57, %v559_v32  ;;  %p1256_p7 = por %p1255_p6, %p1254_p5 }
 0x274   :  { %v567_v54 = vpack.c.bf16 %v558_v53, %v557_v51 }
 0x275   :  { %p1257_p8 = pnand %p1256_p7, %p1250_p4 }
 0x276   :  { %728 = vmatmul.mubr.bf16.gmra.mrb[28].mxu1 %v564_v14 }
 0x277   :  { %737 = vmatprep.mubr.bf16.mxu1 %v1287_v0 }
 0x27e   :  { %738 = vmatmul.mubr.bf16.gmra.mrb[32].mxu1 %v565_v50 }
 0x27f   :  { %747 = vmatprep.mubr.bf16.mxu1 %v1287_v0 }
 0x286   :  { %748 = vmatmul.mubr.bf16.gmra.mrb[36].mxu1 %v566_v36 }
 0x287   :  { %757 = vmatprep.mubr.bf16.mxu1 %v1287_v0 }
 0x28e   :  { %758 = vmatmul.mubr.bf16.gmra.mrb[40].mxu1 %v567_v54 }
 0x28f   :  { %767 = vmatprep.mubr.bf16.mxu1 %v1287_v0 }
 0x296   :  { %768 = vmatmul.mubr.bf16.gmra.mrb[44].mxu1 %v568_v27 }
 0x331   :  { %v699_v60 = vpop.f32.mrb[16].mxu1 }
 0x332   :  { %v1491_v2 = vpop.f32.mrb[17].mxu1 }
 0x333   :  { %v703_v28 = vpop.f32.mrb[18].mxu1 }
 0x334   :  { %v778_v56 = vpack.c.bf16 %v703_v28, %v699_v60  ;;  %v1493_v58 = vpop.f32.mrb[19].mxu1 }
 0x336   :  { %1055 = vmatprep.subr.bf16.mxu0 %v778_v56 }
 0x337   :  { %1056 = vmatpush3.bf16.msra.mxu0 %v778_v56 }
 0x339   :  { %v709_v35 = vpop.f32.mrb[20].mxu1 }
 0x33a   :  { %v711_v59 = vpop.f32.mrb[21].mxu1 }
 0x33b   :  { %v713_v61 = vpop.f32.mrb[22].mxu1 }
 0x33c   :  { %v779_v30 = vpack.c.bf16 %v713_v61, %v709_v35  ;;  %v715_v63 = vpop.f32.mrb[23].mxu1 }
 0x33e   :  { %1057 = vmatprep.subr.bf16.mxu0 %v779_v30 }
 0x33f   :  { %1058 = vmatpush3.bf16.msra.mxu0 %v779_v30 }
 0x341   :  { %v719_v1 = vpop.f32.mrb[24].mxu1 }
 0x342   :  { %v1495_v3 = vpop.f32.mrb[25].mxu1 }
 0x343   :  { %v723_v0 = vpop.f32.mrb[26].mxu1 }
 0x344   :  { %v780_v6 = vpack.c.bf16 %v723_v0, %v719_v1  ;;  %v1497_v42 = vpop.f32.mrb[27].mxu1 }
 0x346   :  { %1059 = vmatprep.subr.bf16.mxu0 %v780_v6 }
 0x347   :  { %1060 = vmatpush3.bf16.msra.mxu0 %v780_v6 }
 0x349   :  { %v729_v7 = vpop.f32.mrb[28].mxu1 }
 0x34a   :  { %v731_v8 = vpop.f32.mrb[29].mxu1 }
 0x34b   :  { %v733_v37 = vpop.f32.mrb[30].mxu1 }
 0x34c   :  { %v781_v9 = vpack.c.bf16 %v733_v37, %v729_v7  ;;  %v735_v12 = vpop.f32.mrb[31].mxu1 }
 0x34e   :  { %1061 = vmatprep.subr.bf16.mxu0 %v781_v9 }
 0x34f   :  { %1062 = vmatpush3.bf16.msra.mxu0 %v781_v9 }
 0x351   :  { %v739_v13 = vpop.f32.mrb[32].mxu1 }
 0x352   :  { %v1499_v45 = vpop.f32.mrb[33].mxu1 }
 0x353   :  { %v743_v14 = vpop.f32.mrb[34].mxu1 }
 0x354   :  { %v782_v15 = vpack.c.bf16 %v743_v14, %v739_v13  ;;  %v1501_v18 = vpop.f32.mrb[35].mxu1 }
 0x356   :  { %1063 = vmatprep.subr.bf16.mxu0 %v782_v15 }
 0x357   :  { %1064 = vmatpush3.bf16.msra.mxu0 %v782_v15 }
 0x359   :  { %v749_v40 = vpop.f32.mrb[36].mxu1 }
 0x35a   :  { %v751_v20 = vpop.f32.mrb[37].mxu1 }
 0x35b   :  { %v753_v21 = vpop.f32.mrb[38].mxu1 }
 0x35c   :  { %v783_v22 = vpack.c.bf16 %v753_v21, %v749_v40  ;;  %v1503_v23 = vpop.f32.mrb[39].mxu1 }
 0x35e   :  { %1065 = vmatprep.subr.bf16.mxu0 %v783_v22 }
 0x35f   :  { %1066 = vmatpush3.bf16.msra.mxu0 %v783_v22 }
 0x361   :  { %v759_v24 = vpop.f32.mrb[40].mxu1 }
 0x362   :  { %v1505_v25 = vpop.f32.mrb[41].mxu1 }
 0x363   :  { %v763_v52 = vpop.f32.mrb[42].mxu1 }
 0x364   :  { %v784_v26 = vpack.c.bf16 %v763_v52, %v759_v24  ;;  %v1507_v47 = vpop.f32.mrb[43].mxu1 }
 0x366   :  { %1067 = vmatprep.subr.bf16.mxu0 %v784_v26 }
 0x367   :  { %1068 = vmatpush3.bf16.msra.mxu0 %v784_v26 }
 0x369   :  { %v769_v29 = vpop.f32.mrb[44].mxu1 }
 0x36a   :  { %v1509_v31 = vpop.f32.mrb[45].mxu1 }
 0x36b   :  { %v773_v33 = vpop.f32.mrb[46].mxu1 }
 0x36c   :  { %v785_v34 = vpack.c.bf16 %v773_v33, %v769_v29  ;;  %v1511_v55 = vpop.f32.mrb[47].mxu1 }
 0x36e   :  { %1069 = vmatprep.subr.bf16.mxu0 %v785_v34 }
 0x36f   :  { %1070 = vmatpush3.bf16.msra.mxu0 %v785_v34 }
 0x372   :  { %1072 = vmatmul.mubr.bf16.vlgmr.msra.gmra.mrb[32].mxu0 %v1425_v4 }
 0x373   :  { %1075 = vmatprep.mubr.bf16.mxu0 %v1427_v5 }
 0x37a   :  { %1076 = vmatmul.mubr.bf16.gmra.mrb[36].mxu0 %v1431_v10 }
 0x37b   :  { %1079 = vmatprep.mubr.bf16.mxu0 %v1433_v11 }
 0x382   :  { %1080 = vmatmul.mubr.bf16.gmra.mrb[40].mxu0 %v1437_v16 }
 0x383   :  { %1083 = vmatprep.mubr.bf16.mxu0 %v1439_v17 }
 0x38a   :  { %1084 = vmatmul.mubr.bf16.gmra.mrb[44].mxu0 %v1443_v19 }
 0x445   :  { %v1073_v36 = vpop.f32.mrb[32].mxu0 }
 0x446   :  { %v829_v39 = vadd.f32 %v1073_v36, %v711_v59  ;;  %v820_v4 = vpop.f32.mrb[33].mxu0 }
 0x447   :  { %v821_v5 = vadd.f32 %v820_v4, %v1491_v2  ;;  %v1074_v50 = vpop.f32.mrb[34].mxu0 }
 0x448   :  { %v892_v10 = vadd.f32 %v1523_v38, %v829_v39  ;;  %v832_v11 = vadd.f32 %v1074_v50, %v715_v63  ;;  %v823_v41 = vpop.f32.mrb[35].mxu0 }
 0x449   :  { %v890_v16 = vadd.f32 %v1523_v38, %v821_v5  ;;  %v824_v17 = vadd.f32 %v823_v41, %v1493_v58 }
 0x44a   :  { %908 = vst [vmem:[#allocation10 + $0x10] sm:$0xff] %v892_v10  ;;  %v893_v19 = vadd.f32 %v1523_v38, %v832_v11 }
 0x44b   :  { %906 = vst [vmem:[#allocation10] sm:$0xff] %v890_v16  ;;  %v891_v43 = vadd.f32 %v1523_v38, %v824_v17 }
 0x44c   :  { %909 = vst [vmem:[#allocation10 + $0x18] sm:$0xff] %v893_v19 }
 0x44d   :  { %907 = vst [vmem:[#allocation10 + $0x8] sm:$0xff] %v891_v43  ;;  %v1077_v44 = vpop.f32.mrb[36].mxu0 }
 0x44e   :  { %v845_v46 = vadd.f32 %v1077_v44, %v731_v8  ;;  %v836_v48 = vpop.f32.mrb[37].mxu0 }
 0x44f   :  { %v837_v49 = vadd.f32 %v836_v48, %v1495_v3  ;;  %v1078_v62 = vpop.f32.mrb[38].mxu0 }
 0x450   :  { %v896_v32 = vadd.f32 %v1523_v38, %v845_v46  ;;  %v848_v57 = vadd.f32 %v1078_v62, %v735_v12  ;;  %v839_v51 = vpop.f32.mrb[39].mxu0 }
 0x451   :  { %v894_v53 = vadd.f32 %v1523_v38, %v837_v49  ;;  %v840_v27 = vadd.f32 %v839_v51, %v1497_v42 }
 0x452   :  { %912 = vst [vmem:[#allocation10 + $0x30] sm:$0xff] %v896_v32  ;;  %v897_v54 = vadd.f32 %v1523_v38, %v848_v57 }
 0x453   :  { %910 = vst [vmem:[#allocation10 + $0x20] sm:$0xff] %v894_v53  ;;  %v895_v60 = vadd.f32 %v1523_v38, %v840_v27 }
 0x454   :  { %913 = vst [vmem:[#allocation10 + $0x38] sm:$0xff] %v897_v54 }
 0x455   :  { %911 = vst [vmem:[#allocation10 + $0x28] sm:$0xff] %v895_v60  ;;  %v1081_v2 = vpop.f32.mrb[40].mxu0 }
 0x456   :  { %v861_v28 = vadd.f32 %v1081_v2, %v751_v20  ;;  %v852_v56 = vpop.f32.mrb[41].mxu0 }
 0x457   :  { %v853_v58 = vadd.f32 %v852_v56, %v1499_v45  ;;  %v1082_v35 = vpop.f32.mrb[42].mxu0 }
 0x458   :  { %v900_v59 = vadd.f32 %v1523_v38, %v861_v28  ;;  %v864_v61 = vadd.f32 %v1082_v35, %v1503_v23  ;;  %v855_v30 = vpop.f32.mrb[43].mxu0 }
 0x459   :  { %v898_v63 = vadd.f32 %v1523_v38, %v853_v58  ;;  %v856_v1 = vadd.f32 %v855_v30, %v1501_v18 }
 0x45a   :  { %916 = vst [vmem:[#allocation10 + $0x50] sm:$0xff] %v900_v59  ;;  %v901_v3 = vadd.f32 %v1523_v38, %v864_v61 }
 0x45b   :  { %914 = vst [vmem:[#allocation10 + $0x40] sm:$0xff] %v898_v63  ;;  %v899_v0 = vadd.f32 %v1523_v38, %v856_v1 }
 0x45c   :  { %917 = vst [vmem:[#allocation10 + $0x58] sm:$0xff] %v901_v3 }
 0x45d   :  { %915 = vst [vmem:[#allocation10 + $0x48] sm:$0xff] %v899_v0  ;;  %v1085_v6 = vpop.f32.mrb[44].mxu0 }
 0x45e   :  { %v877_v42 = vadd.f32 %v1085_v6, %v1509_v31  ;;  %v868_v7 = vpop.f32.mrb[45].mxu0 }
 0x45f   :  { %v869_v8 = vadd.f32 %v868_v7, %v1505_v25  ;;  %v1086_v37 = vpop.f32.mrb[46].mxu0 }
 0x460   :  { %v904_v9 = vadd.f32 %v1523_v38, %v877_v42  ;;  %v880_v12 = vadd.f32 %v1086_v37, %v1511_v55  ;;  %v871_v13 = vpop.f32.mrb[47].mxu0 }
 0x461   :  { %v902_v45 = vadd.f32 %v1523_v38, %v869_v8  ;;  %v872_v14 = vadd.f32 %v871_v13, %v1507_v47 }
 0x462   :  { %920 = vst [vmem:[#allocation10 + $0x70] sm:$0xff] %v904_v9  ;;  %v905_v15 = vadd.f32 %v1523_v38, %v880_v12 }
 0x463   :  { %918 = vst [vmem:[#allocation10 + $0x60] sm:$0xff] %v902_v45  ;;  %v903_v18 = vadd.f32 %v1523_v38, %v872_v14 }
 0x464   :  { %921 = vst [vmem:[#allocation10 + $0x78] sm:$0xff] %v905_v15 }
 0x465   :  { %919 = vst [vmem:[#allocation10 + $0x68] sm:$0xff] %v903_v18 }
 0x466   :  { %1260 = shalt.err (!%p1257_p8)
}
 0x467   :  { %s1261_s28 = scalar_lea.hbm %s1573_s6, 2048 }
 0x468   :  { %p1262_p9 = scmp.ne.s32.totalorder %s1573_s6, %s1261_s28  ;;  %p1265_p10 = scmp.lt.u32.totalorder %s1261_s28, %s1573_s6 }
 0x46a   :  { %p1267_p11 = pnand %p1265_p10, %p1262_p9 }
 0x46c   :  { %1270 = shalt.err (!%p1267_p11)
}
 0x46d   :  { %933 = dma.vmem_to_hbm [thread:$0]  %s928_s23, 2048, %s1573_s6, [#allocation4], %s1284_s0, %s1284_s0, %s1285_s24  }
 0x46e   :  { %1277 = dma.done.wait [#allocation4], 2048  }
 0x46f   :  { %1278 = vsyncadd [#allocation4], 4294965248 }
 0x470   :  { %937 = vsyncpa [#allocation3], 1 }
 0x471   :  { %938 = vsyncpa [#allocation6], 1 }
 0x472   :  { %939 = vsyncpa [#allocation9], 1 }
 0x473   :  { %940 = vsyncpa [#allocation4], 1 }

</bundles_post_ra>
